<compile_context>
chip_gen: v5e
topology: v5e:2x2
jax: 0.10.0
libtpu: 0.0.40
codegen_flags: <defaults>
</compile_context>

<pallas_src>
import math

import jax
import jax.numpy as jnp
from jax.experimental import pallas as pl
from jax.experimental.pallas import tpu as pltpu


def _pe_add_kernel(pe_ref, x_ref, o_ref):
    # pe_ref: (TR, L); x_ref/o_ref: (Bb, TR, L).
    # Trailing-dim broadcast add on the VPU; stores are lane-dense.
    o_ref[...] = x_ref[...] + pe_ref[...]


def make_positional_encoding(d_model: int, max_seq_length: int) -> jnp.ndarray:
    """Deterministic buffer construction — mirrors PositionalEncoding.__init__."""
    position = jnp.arange(max_seq_length, dtype=jnp.float32)[:, None]            # (L, 1)
    div_term = jnp.exp(
        jnp.arange(0, d_model, 2, dtype=jnp.float32) * (-math.log(10000.0) / d_model)
    )                                                                             # (D/2,)
    pe = jnp.zeros((max_seq_length, d_model), dtype=jnp.float32)
    pe = pe.at[:, 0::2].set(jnp.sin(position * div_term))
    pe = pe.at[:, 1::2].set(jnp.cos(position * div_term))
    return pe[None, :, :]                                                         # (1, L, D)


def positional_encoding_forward(
    x: jnp.ndarray,
    pe: jnp.ndarray,
    *,
    target_tile_bytes: int = 4 * 1024 * 1024,   # ~4 MiB x-tile budget (1-4 MiB sweet spot)
    donate_x: bool = False,                      # set True only if the caller donates x
) -> jnp.ndarray:
    """Equivalent of: return self.pe[:, :x.size(1)] + x."""
    B, S, D = x.shape
    # Pre-cast once in the wrapper (no per-step cast in the kernel; halves pe
    # HBM traffic / VMEM footprint when x is bf16).
    pe_sd = pe[0, :S, :].astype(x.dtype)                                          # (S, D)

    itemsize = jnp.dtype(x.dtype).itemsize
    sublane = max(8, 32 // itemsize)              # 8 f32, 16 bf16, 32 int8/fp8

    # Lane-dense view: fold (S, D) -> (R, 128) only when D < 128 (masked stores
    # are the dominant loss there) and the fold is exact.  For D >= 128 not a
    # multiple of 128, the native layout avoids potential relayout copies.
    if D % 128 == 0:
        R, L = S, D
        x_v, pe_v = x, pe_sd
    elif D < 128 and (S * D) % 128 == 0:
        L = 128
        R = (S * D) // L
        x_v = x.reshape(B, R, L)
        pe_v = pe_sd.reshape(R, L)
    else:
        R, L = S, D
        x_v, pe_v = x, pe_sd

    # Small batches: fold the batch axis into the block so every grid step
    # moves B times more data and pe stays trivially resident.
    collapse_batch = B <= 8

    # Row tile sized by byte budget, aligned to the packed-dtype sublane.
    row_bytes = (B if collapse_batch else 1) * L * itemsize
    tr_budget = max(sublane, (target_tile_bytes // row_bytes) // sublane * sublane)
    tr = R if tr_budget >= R else tr_budget        # full extent is always legal
    n_tiles = pl.cdiv(R, tr)

    # Megacore: if everything fits in one tile and batch cannot serve as a
    # parallel axis, split the row axis so both v7x TensorCores get work.
    if n_tiles == 1 and (collapse_batch or B == 1) and R >= 2 * sublane:
        tr = max(sublane, ((R + 1) // 2) // sublane * sublane)
        n_tiles = pl.cdiv(R, tr)

    if collapse_batch:
        grid = (n_tiles,)
        in_specs = [
            pl.BlockSpec((tr, L), lambda s: (s, 0)),          # pe: shared over batch
            pl.BlockSpec((B, tr, L), lambda s: (0, s, 0)),    # x: whole batch per step
        ]
        out_specs = pl.BlockSpec((B, tr, L), lambda s: (0, s, 0))
        dims = ("parallel",)
    else:
        grid = (n_tiles, B)                                    # batch innermost
        in_specs = [
            pl.BlockSpec((tr, L), lambda s, b: (s, 0)),       # pe tile resident over b
            pl.BlockSpec((1, tr, L), lambda s, b: (b, s, 0)),
        ]
        out_specs = pl.BlockSpec((1, tr, L), lambda s, b: (b, s, 0))
        dims = ("parallel", "parallel")

    out_v = pl.pallas_call(
        _pe_add_kernel,
        out_shape=jax.ShapeDtypeStruct((B, R, L), x.dtype),
        grid=grid,
        in_specs=in_specs,
        out_specs=out_specs,
        input_output_aliases=({1: 0} if donate_x else {}),
        compiler_params=pltpu.CompilerParams(
            dimension_semantics=dims,
            vmem_limit_bytes=32 * 1024 * 1024,   # safe on v5e/v6e/v7x
        ),
    )(pe_v, x_v)

    # TODO(synk): optionally synthesize the sin/cos tile in-kernel on the EUP
    # to drop the pe input entirely (a VMEM-budget play more than a BW play).
    return out_v.reshape(B, S, D)


if __name__ == "__main__":
    d_model = 32
    max_seq_length = 16
    batch = 2
    seq_len = 8

    key = jax.random.PRNGKey(0)
    x = jax.random.normal(key, (batch, seq_len, d_model), dtype=jnp.float32)

    pe = make_positional_encoding(d_model, max_seq_length)

    out = positional_encoding_forward(x, pe)
    out = jax.block_until_ready(out)

    # correctness check against the pure-JAX reference
    ref = pe[:, :seq_len] + x
    assert out.shape == (batch, seq_len, d_model)
    assert jnp.allclose(out, ref, atol=1e-6, rtol=1e-6)

    print("KERNEL_OK")
</pallas_src>

<mosaic_0001>
module attributes {stable_mosaic.version = 11 : i64} {
  func.func @_pe_add_kernel(%arg0: i32, %arg1: memref<2x128xf32, #tpu.memory_space<vmem>>, %arg2: memref<2x2x128xf32, #tpu.memory_space<vmem>>, %arg3: memref<2x2x128xf32, #tpu.memory_space<vmem>>) attributes {dimension_semantics = [#tpu.dimension_semantics<parallel>], iteration_bounds = array<i64: 1>, scalar_prefetch = 0 : i64, scratch_operands = 0 : i64, tpu.core_type = #tpu.core_type<tc>, window_params = [{transform_indices = @transform_0, window_bounds = array<i64: 2, 128>}, {transform_indices = @transform_1, window_bounds = array<i64: 2, 2, 128>}, {transform_indices = @transform_2, window_bounds = array<i64: 2, 2, 128>}]} {
    %c0 = arith.constant 0 : index
    %c0_0 = arith.constant 0 : index
    %c0_1 = arith.constant 0 : index
    %0 = vector.load %arg2[%c0, %c0_0, %c0_1] : memref<2x2x128xf32, #tpu.memory_space<vmem>>, vector<2x2x128xf32>
    %c0_2 = arith.constant 0 : index
    %c0_3 = arith.constant 0 : index
    %1 = vector.load %arg1[%c0_2, %c0_3] : memref<2x128xf32, #tpu.memory_space<vmem>>, vector<2x128xf32>
    %2 = vector.shape_cast %1 : vector<2x128xf32> to vector<1x2x128xf32>
    %3 = vector.broadcast %2 : vector<1x2x128xf32> to vector<2x2x128xf32>
    %4 = arith.addf %0, %3 : vector<2x2x128xf32>
    %c0_4 = arith.constant 0 : index
    %c0_5 = arith.constant 0 : index
    %c0_6 = arith.constant 0 : index
    %5 = vector.load %arg3[%c0_4, %c0_5, %c0_6] : memref<2x2x128xf32, #tpu.memory_space<vmem>>, vector<2x2x128xf32>
    tpu.vector_store %arg3[%c0_4, %c0_5, %c0_6], %4 {strides = array<i32>} : memref<2x2x128xf32, #tpu.memory_space<vmem>>, vector<2x2x128xf32>,
    return
  }
  func.func @transform_0(%arg0: i32) -> (i32, i32) {
    %c0_i32 = arith.constant 0 : i32
    %c0_i32_0 = arith.constant 0 : i32
    return %arg0, %c0_i32 : i32, i32
  }
  func.func @transform_1(%arg0: i32) -> (i32, i32, i32) {
    %c0_i32 = arith.constant 0 : i32
    %c0_i32_0 = arith.constant 0 : i32
    %c0_i32_1 = arith.constant 0 : i32
    return %c0_i32, %arg0, %c0_i32_0 : i32, i32, i32
  }
  func.func @transform_2(%arg0: i32) -> (i32, i32, i32) {
    %c0_i32 = arith.constant 0 : i32
    %c0_i32_0 = arith.constant 0 : i32
    %c0_i32_1 = arith.constant 0 : i32
    return %c0_i32, %arg0, %c0_i32_0 : i32, i32, i32
  }
}

</mosaic_0001>

<bundles_post_ra>
// kernel: tpu_custom_call.1
= control target key start
LH: loop header
LB: loop body
LE: loop exit
PB: predicated region body
PF: predicated region fallthrough
CT: control target
= control target key end

     0   :  { %7 = vsyncpa [#allocation3], 0  ;;  %s181_s0 = inlined_call_operand.hbm [shape: f32[2,128], index: 0, kind: input, shape index: {}]   ;;  %s182_s1 = inlined_call_operand.hbm [shape: f32[2,2,128], index: 1, kind: input, shape index: {}]   ;;  %s183_s2 = inlined_call_operand.hbm [shape: f32[2,2,128], index: 2, kind: output, shape index: {}]  }
   0x1   :  { %8 = vsyncpa [#allocation6], 0 }
   0x2   :  { %9 = vsyncpa [#allocation4], 0  ;;  %s15_s11 = sshll.u32 %s181_s0, 4  ;;  %s152_s12 = smov [#allocation2]   ;;  %s16_s11 = int_to_ptr.hbm [resolvable:$true] %s15_s11 }
   0x3   :  { %s17_s13 = sshll.u32 %s152_s12, 4  ;;  %s25_s16 = sshll.u32 %s182_s1, 4  ;;  %s18_s13 = int_to_ptr.vmem [resolvable:$true] %s17_s13  ;;  %s26_s16 = int_to_ptr.hbm [resolvable:$true] %s25_s16 }
   0x4   :  { %20 = dma.hbm_to_vmem [thread:$0]  %s16_s11, 32, %s18_s13, [#allocation3]  }
   0x5   :  { %s153_s17 = smov [#allocation5]   ;;  %s154_s19 = smov 32  }
   0x6   :  { %s27_s18 = sshll.u32 %s153_s17, 4  ;;  %s155_s20 = smov 2   ;;  %s28_s18 = int_to_ptr.vmem [resolvable:$true] %s27_s18 }
   0x7   :  { %33 = dma.hbm_to_vmem [thread:$0]  %s26_s16, 64, %s28_s18, [#allocation6], %s154_s19, %s154_s19, %s155_s20  }
   0x8   :  { %146 = dma.done.wait [#allocation3], 32  }
   0x9   :  { %147 = vsyncadd [#allocation3], 4294967264 }
   0xa   :  { %148 = dma.done.wait [#allocation6], 64  }
   0xb   :  { %149 = vsyncadd [#allocation6], 4294967232  ;;  %s156_s0 = smov [#allocation7]   ;;  %s55_s24 = sshll.u32 %s183_s2, 4  ;;  %v42_v0 = vld [vmem:[#allocation5] sm:$0x3]  ;;  %s56_s24 = int_to_ptr.hbm [resolvable:$true] %s55_s24 }
   0xc   :  { %s53_s21 = sshll.u32 %s156_s0, 4  ;;  %v44_v1 = vld [vmem:[#allocation2] sm:$0x3]  ;;  %v43_v2 = vld [vmem:[#allocation5 + $0x2] sm:$0x3]  ;;  %s54_s21 = int_to_ptr.vmem [resolvable:$true] %s53_s21 }
   0xd   :  { %v45_v3 = vadd.f32 %v44_v1, %v42_v0  ;;  %v46_v4 = vadd.f32 %v44_v1, %v43_v2 }
   0xf   :  { %47 = vst [vmem:[#allocation7] sm:$0x3] %v45_v3 }
  0x10   :  { %48 = vst [vmem:[#allocation7 + $0x2] sm:$0x3] %v46_v4 }
  0x11   :  { %61 = dma.vmem_to_hbm [thread:$0]  %s54_s21, 64, %s56_s24, [#allocation4], %s154_s19, %s154_s19, %s155_s20  }
  0x12   :  { %150 = dma.done.wait [#allocation4], 64  }
  0x13   :  { %151 = vsyncadd [#allocation4], 4294967232 }
  0x14   :  { %66 = vsyncpa [#allocation3], 1 }
  0x15   :  { %67 = vsyncpa [#allocation6], 1 }
  0x16   :  { %68 = vsyncpa [#allocation4], 1 }

</bundles_post_ra>
